<compile_context>
chip_gen: v7x
topology: tpu7x:2x2x1
jax: 0.10.0
libtpu: 0.0.40
codegen_flags: <defaults>
</compile_context>

<pallas_src>
import functools

import jax
import jax.numpy as jnp
from jax.experimental import pallas as pl
from jax.experimental.pallas import tpu as pltpu


def _round_up(x, m):
    return (x + m - 1) // m * m


def _actor_head_kernel(x_ref, w_ref, b_ref, logits_ref, logp_ref, *,
                       agents_num, d_out):
    # One fused MXU matmul for all agent heads: [TB, in] @ [in, n_pad] + bias.
    logits = (
        jnp.dot(x_ref[...], w_ref[...], preferred_element_type=jnp.float32)
        + b_ref[...]
    )
    logits_ref[...] = logits

    # Fused Categorical(logits=...) normalization: log_softmax over each
    # agent's own d_out-wide column segment (static lane slices, A <= 2).
    tb, n_pad = logits.shape
    n_real = agents_num * d_out
    segs = []
    for a in range(agents_num):
        seg = logits[:, a * d_out:(a + 1) * d_out]
        m = jnp.max(seg, axis=-1, keepdims=True)
        z = seg - m
        lse = jnp.log(jnp.sum(jnp.exp(z), axis=-1, keepdims=True))
        segs.append(z - lse)
    if n_pad > n_real:
        segs.append(jnp.zeros((tb, n_pad - n_real), jnp.float32))
    # Single full-width (lane-dense) store of the normalized log-probs.
    logp_ref[...] = jnp.concatenate(segs, axis=-1)


def multi_linear_actor_head_packed(x2d, w_packed, b_packed, *, agents_num,
                                   d_out, block_b=256):
    """x2d: [B, in]; w_packed: [in, A*out]; b_packed: [1, A*out].

    Returns (logits2d, log_probs2d), each [B, A*out] f32.
    """
    B, d_in = x2d.shape
    n_real = agents_num * d_out
    n_pad = _round_up(n_real, 128)

    # Zero-pad output columns so stores are lane-dense (128-lane multiples).
    if n_pad != n_real:
        w_packed = jnp.pad(w_packed, ((0, 0), (0, n_pad - n_real)))
        b_packed = jnp.pad(b_packed, ((0, 0), (0, n_pad - n_real)))

    # Batch tile: multiple of 8 sublanes, capped at block_b; pad B to a whole
    # number of tiles (padded rows are dropped after the call).
    tb = min(block_b, _round_up(B, 8))
    b_pad = _round_up(B, tb)
    if b_pad != B:
        x2d = jnp.pad(x2d, ((0, b_pad - B), (0, 0)))

    kernel = functools.partial(_actor_head_kernel,
                               agents_num=agents_num, d_out=d_out)

    logits, logp = pl.pallas_call(
        kernel,
        out_shape=(jax.ShapeDtypeStruct((b_pad, n_pad), jnp.float32),
                   jax.ShapeDtypeStruct((b_pad, n_pad), jnp.float32)),
        grid_spec=pltpu.PrefetchScalarGridSpec(
            num_scalar_prefetch=0,
            grid=(b_pad // tb,),
            in_specs=[
                pl.BlockSpec((tb, d_in), lambda i: (i, 0)),    # streamed batch tile
                pl.BlockSpec((d_in, n_pad), lambda i: (0, 0)),  # VMEM-resident W
                pl.BlockSpec((1, n_pad), lambda i: (0, 0)),     # VMEM-resident b
            ],
            out_specs=(pl.BlockSpec((tb, n_pad), lambda i: (i, 0)),
                       pl.BlockSpec((tb, n_pad), lambda i: (i, 0))),
        ),
        compiler_params=pltpu.CompilerParams(
            dimension_semantics=("parallel",)),
    )(x2d.astype(jnp.float32),
      w_packed.astype(jnp.float32),
      b_packed.astype(jnp.float32))

    return logits[:B, :n_real], logp[:B, :n_real]


def multi_linear_actor_head_forward(x, params):
    """Forward of MultiLinearActorHead.

    x:      [B, 1, inputs_num]  (each head sees the same x, as in the module)
    params: {"ws": [A arrays of (in, out)], "bs": [A arrays of (out,)]}
            (weights stored [in, out], i.e. y = x @ W + b, transposed vs torch)

    Returns (logits, log_probs), each [B, agents_num, outputs_num]:
      * logits    == torch.cat([head_a(x) for a], dim=-2)
      * log_probs == Categorical(logits=logits).logits after normalization.
    """
    ws, bs = params["ws"], params["bs"]
    agents_num = len(ws)
    B = x.shape[0]
    d_in = x.shape[-1]
    d_out = ws[0].shape[1]

    # Host-side packing -> 3 DMA slabs total (x, W_packed, b_packed).
    w_packed = jnp.concatenate(ws, axis=1)                           # [in, A*out]
    b_packed = jnp.concatenate(bs, axis=0).reshape(1, agents_num * d_out)

    logits2d, logp2d = multi_linear_actor_head_packed(
        x.reshape(B, d_in), w_packed, b_packed,
        agents_num=agents_num, d_out=d_out)
    return (logits2d.reshape(B, agents_num, d_out),
            logp2d.reshape(B, agents_num, d_out))


def reference_forward(x, params):
    """Pure-JAX reference mirroring the PyTorch module semantics."""
    outs = [x @ w + b for w, b in zip(params["ws"], params["bs"])]   # each [B,1,out]
    return jnp.concatenate(outs, axis=-2)                            # [B, A, out]


def make_params(key, agents_num, inputs_num, outputs_num):
    ks = jax.random.split(key, 2 * agents_num)
    ws = [(0.1 * jax.random.normal(ks[2 * a], (inputs_num, outputs_num))
           ).astype(jnp.float32) for a in range(agents_num)]
    bs = [(0.1 * jax.random.normal(ks[2 * a + 1], (outputs_num,))
           ).astype(jnp.float32) for a in range(agents_num)]
    return {"ws": ws, "bs": bs}


if __name__ == "__main__":
    key = jax.random.PRNGKey(0)
    B, INPUTS_NUM, OUTPUTS_NUM = 8, 64, 64

    for agents_num in (1, 2):
        kp = jax.random.fold_in(key, agents_num)
        k_param, k_x = jax.random.split(kp)
        params = make_params(k_param, agents_num, INPUTS_NUM, OUTPUTS_NUM)
        x = jax.random.normal(k_x, (B, 1, INPUTS_NUM), dtype=jnp.float32)

        logits, log_probs = multi_linear_actor_head_forward(x, params)
        logits = jax.block_until_ready(logits)
        log_probs = jax.block_until_ready(log_probs)

        ref_logits = reference_forward(x, params)
        ref_logp = jax.nn.log_softmax(ref_logits, axis=-1)

        assert logits.shape == (B, agents_num, OUTPUTS_NUM)
        assert log_probs.shape == (B, agents_num, OUTPUTS_NUM)
        assert jnp.allclose(logits, ref_logits, atol=1e-5, rtol=1e-5), \
            f"logits mismatch vs JAX reference (agents_num={agents_num})"
        assert jnp.allclose(log_probs, ref_logp, atol=1e-5, rtol=1e-5), \
            f"log_softmax mismatch vs JAX reference (agents_num={agents_num})"
        # Categorical normalization sanity: probabilities sum to 1 per agent.
        assert jnp.allclose(jnp.exp(log_probs).sum(-1),
                            jnp.ones((B, agents_num)), atol=1e-5)

    print("KERNEL_OK")
</pallas_src>

<mosaic_0001>
module attributes {stable_mosaic.version = 11 : i64} {
  func.func @_actor_head_kernel(%arg0: i32, %arg1: memref<8x64xf32, #tpu.memory_space<vmem>>, %arg2: memref<64x128xf32, #tpu.memory_space<vmem>>, %arg3: memref<1x128xf32, #tpu.memory_space<vmem>>, %arg4: memref<8x128xf32, #tpu.memory_space<vmem>>, %arg5: memref<8x128xf32, #tpu.memory_space<vmem>>) attributes {dimension_semantics = [#tpu.dimension_semantics<parallel>], iteration_bounds = array<i64: 1>, scalar_prefetch = 0 : i64, scratch_operands = 0 : i64, tpu.core_type = #tpu.core_type<tc>, window_params = [{transform_indices = @transform_0, window_bounds = array<i64: 8, 64>}, {pipeline_mode = #tpu.pipeline_mode<synchronous>, transform_indices = @transform_1, window_bounds = array<i64: 64, 128>}, {pipeline_mode = #tpu.pipeline_mode<synchronous>, transform_indices = @transform_2, window_bounds = array<i64: 1, 128>}, {transform_indices = @transform_3, window_bounds = array<i64: 8, 128>}, {transform_indices = @transform_4, window_bounds = array<i64: 8, 128>}]} {
    %c0 = arith.constant 0 : index
    %c0_0 = arith.constant 0 : index
    %0 = vector.load %arg1[%c0, %c0_0] : memref<8x64xf32, #tpu.memory_space<vmem>>, vector<8x64xf32>
    %c0_1 = arith.constant 0 : index
    %c0_2 = arith.constant 0 : index
    %1 = vector.load %arg2[%c0_1, %c0_2] : memref<64x128xf32, #tpu.memory_space<vmem>>, vector<64x128xf32>
    %cst = arith.constant dense<0.000000e+00> : vector<8x128xf32>
    %2 = tpu.matmul %0, %1, %cst {dimension_numbers = #tpu.dot_dimension_numbers<[1], [0], [0], [1], [0, 0, 1, 1], [], []>} : vector<8x64xf32>, vector<64x128xf32>, vector<8x128xf32> -> vector<8x128xf32>
    %c0_3 = arith.constant 0 : index
    %c0_4 = arith.constant 0 : index
    %3 = vector.load %arg3[%c0_3, %c0_4] : memref<1x128xf32, #tpu.memory_space<vmem>>, vector<1x128xf32>
    %4 = vector.broadcast %3 : vector<1x128xf32> to vector<8x128xf32>
    %5 = arith.addf %2, %4 : vector<8x128xf32>
    %c0_5 = arith.constant 0 : index
    %c0_6 = arith.constant 0 : index
    %6 = vector.load %arg4[%c0_5, %c0_6] : memref<8x128xf32, #tpu.memory_space<vmem>>, vector<8x128xf32>
    tpu.vector_store %arg4[%c0_5, %c0_6], %5 {strides = array<i32>} : memref<8x128xf32, #tpu.memory_space<vmem>>, vector<8x128xf32>,
    %7 = vector.extract_strided_slice %5 {offsets = [0, 0], sizes = [8, 64], strides = [1, 1]} : vector<8x128xf32> to vector<8x64xf32>
    %cst_7 = arith.constant dense<0xFF800000> : vector<8xf32>
    %8 = vector.multi_reduction <maximumf>, %7, %cst_7 [1] : vector<8x64xf32> to vector<8xf32>
    %9 = vector.shape_cast %8 : vector<8xf32> to vector<8x1xf32>
    %10 = vector.broadcast %9 : vector<8x1xf32> to vector<8x64xf32>
    %11 = arith.subf %7, %10 : vector<8x64xf32>
    %12 = math.exp %11 : vector<8x64xf32>
    %cst_8 = arith.constant dense<0.000000e+00> : vector<8xf32>
    %13 = vector.multi_reduction <add>, %12, %cst_8 [1] : vector<8x64xf32> to vector<8xf32>
    %14 = vector.shape_cast %13 : vector<8xf32> to vector<8x1xf32>
    %15 = math.log %14 : vector<8x1xf32>
    %16 = vector.broadcast %15 : vector<8x1xf32> to vector<8x64xf32>
    %17 = arith.subf %11, %16 : vector<8x64xf32>
    %cst_9 = arith.constant 0.000000e+00 : f32
    %18 = vector.broadcast %cst_9 : f32 to vector<8x64xf32>
    %19 = tpu.concatenate %17, %18 in 1 : vector<8x64xf32>, vector<8x64xf32> -> vector<8x128xf32>
    %c0_10 = arith.constant 0 : index
    %c0_11 = arith.constant 0 : index
    %20 = vector.load %arg5[%c0_10, %c0_11] : memref<8x128xf32, #tpu.memory_space<vmem>>, vector<8x128xf32>
    tpu.vector_store %arg5[%c0_10, %c0_11], %19 {strides = array<i32>} : memref<8x128xf32, #tpu.memory_space<vmem>>, vector<8x128xf32>,
    return
  }
  func.func @transform_0(%arg0: i32) -> (i32, i32) {
    %c0_i32 = arith.constant 0 : i32
    %c0_i32_0 = arith.constant 0 : i32
    return %arg0, %c0_i32 : i32, i32
  }
  func.func @transform_1(%arg0: i32) -> (i32, i32) {
    %c0_i32 = arith.constant 0 : i32
    %c0_i32_0 = arith.constant 0 : i32
    %c0_i32_1 = arith.constant 0 : i32
    return %c0_i32, %c0_i32_0 : i32, i32
  }
  func.func @transform_2(%arg0: i32) -> (i32, i32) {
    %c0_i32 = arith.constant 0 : i32
    %c0_i32_0 = arith.constant 0 : i32
    %c0_i32_1 = arith.constant 0 : i32
    return %c0_i32, %c0_i32_0 : i32, i32
  }
  func.func @transform_3(%arg0: i32) -> (i32, i32) {
    %c0_i32 = arith.constant 0 : i32
    %c0_i32_0 = arith.constant 0 : i32
    return %arg0, %c0_i32 : i32, i32
  }
  func.func @transform_4(%arg0: i32) -> (i32, i32) {
    %c0_i32 = arith.constant 0 : i32
    %c0_i32_0 = arith.constant 0 : i32
    return %arg0, %c0_i32 : i32, i32
  }
}

</mosaic_0001>

<bundles_post_ra>
// kernel: tpu_custom_call.1
= control target key start
LH: loop header
LB: loop body
LE: loop exit
PB: predicated region body
PF: predicated region fallthrough
CT: control target
= control target key end

     0   :  { %10 = vsyncpa [#allocation3], 0  ;;  %s426_s0 = inlined_call_operand.hbm [shape: f32[8,64], index: 0, kind: input, shape index: {}]   ;;  %s427_s1 = inlined_call_operand.hbm [shape: f32[64,128], index: 1, kind: input, shape index: {}]   ;;  %s428_s2 = inlined_call_operand.vmem [shape: f32[1,128], index: 2, kind: input, shape index: {}]   ;;  %s429_s3 = inlined_call_operand.hbm [shape: f32[8,128], index: 3, kind: output, shape index: {0}]   ;;  %s430_s4 = inlined_call_operand.hbm [shape: f32[8,128], index: 4, kind: output, shape index: {1}]  }
   0x1   :  { %11 = vsyncpa [#allocation6], 0 }
   0x2   :  { %12 = vsyncpa [#allocation4], 0 }
   0x3   :  { %13 = vsyncpa [#allocation9], 0  ;;  %s330_s15 = smov [#allocation2]   ;;  %s331_s17 = smov [#allocation5]  }
   0x4   :  { %s20_s16 = sshll.u32 %s330_s15, 4  ;;  %s29_s18 = sshll.u32 %s331_s17, 4  ;;  %s21_s16 = int_to_ptr.vmem [resolvable:$true] %s20_s16  ;;  %s364_s18 = int_to_ptr.vmem [resolvable:$true] %s29_s18 }
   0x5   :  { %s234_s21 = scalar_lea.hbm %s426_s0, 128 }
   0x6   :  { %p235_p0 = scmp.ne.s32.totalorder %s426_s0, %s234_s21  ;;  %p238_p1 = scmp.lt.u32.totalorder %s234_s21, %s426_s0 }
   0x8   :  { %p240_p2 = pnand %p238_p1, %p235_p0 }
   0xa   :  { %243 = shalt.err (!%p240_p2)
}
   0xb   :  { %s244_s26 = scalar_lea.vmem %s21_s16, 128  ;;  %p249_p4 = scmp.lt.s32.totalorder %s21_s16, %s21_s16 }
   0xc   :  { %p245_p3 = scmp.ne.s32.totalorder %s21_s16, %s244_s26  ;;  %p250_p5 = scmp.lt.s32.totalorder %s244_s26, %s244_s26 }
   0xe   :  { %p251_p6 = por %p250_p5, %p249_p4 }
  0x10   :  { %p252_p7 = pnand %p251_p6, %p245_p3 }
  0x12   :  { %255 = shalt.err (!%p252_p7)
}
  0x13   :  { %23 = dma.hbm_to_vmem [thread:$0]  %s426_s0, 128, %s21_s16, [#allocation3]  }
  0x14   :  { %s256_s5 = scalar_lea.hbm %s427_s1, 1024 }
  0x15   :  { %p257_p8 = scmp.ne.s32.totalorder %s427_s1, %s256_s5  ;;  %p260_p9 = scmp.lt.u32.totalorder %s256_s5, %s427_s1 }
  0x17   :  { %p262_p10 = pnand %p260_p9, %p257_p8 }
  0x19   :  { %265 = shalt.err (!%p262_p10)
}
  0x1a   :  { %s266_s10 = scalar_lea.vmem %s364_s18, 1024  ;;  %p271_p12 = scmp.lt.s32.totalorder %s364_s18, %s364_s18 }
  0x1b   :  { %p267_p11 = scmp.ne.s32.totalorder %s364_s18, %s266_s10  ;;  %p272_p13 = scmp.lt.s32.totalorder %s266_s10, %s266_s10 }
  0x1d   :  { %p273_p0 = por %p272_p13, %p271_p12 }
  0x1f   :  { %p274_p1 = pnand %p273_p0, %p267_p11 }
  0x21   :  { %277 = shalt.err (!%p274_p1)
}
  0x22   :  { %s332_s0 = smov 128   ;;  %s333_s11 = smov 8  }
  0x23   :  { %35 = dma.hbm_to_vmem [thread:$0]  %s427_s1, 1024, %s364_s18, [#allocation6], %s332_s0, %s332_s0, %s333_s11  }
  0x24   :  { %322 = dma.done.wait [#allocation3], 128  }
  0x25   :  { %323 = vsyncadd [#allocation3], 4294967168 }
  0x26   :  { %324 = dma.done.wait [#allocation6], 1024  }
  0x27   :  { %325 = vsyncadd [#allocation6], 4294966272  ;;  %v334_v0 = vmov 0.0|0.0   ;;  %vm335_vm0 = vmmov 0   ;;  %v336_v1 = vmov 0.0   ;;  %v45_v2 = vld [vmem:[#allocation5] sm:$0xff] }
  0x28   :  { %209 = vmatprep.subr.bf16.mxu0 %v334_v0  ;;  %206 = vmatprep.mubr.msk.f32.mxu0 %vm335_vm0, %v336_v1  ;;  %v46_v3 = vld [vmem:[#allocation5 + $0x8] sm:$0xff]  ;;  %v47_v4 = vld [vmem:[#allocation5 + $0x10] sm:$0xff]  ;;  %v48_v6 = vld [vmem:[#allocation5 + $0x18] sm:$0xff]  ;;  %vm60_vm1 = vcmask 523264   ;;  %s337_s15 = smov [#allocation7]  }
  0x29   :  { %v210_v5 = vpack.c.bf16 %v46_v3, %v45_v2  ;;  %v213_v7 = vpack.c.bf16 %v48_v6, %v47_v4  ;;  %v49_v8 = vld [vmem:[#allocation5 + $0x20] sm:$0xff]  ;;  %v50_v9 = vld [vmem:[#allocation5 + $0x28] sm:$0xff]  ;;  %v51_v11 = vld [vmem:[#allocation5 + $0x30] sm:$0xff]  ;;  %s155_s16 = sshll.u32 %s337_s15, 4  ;;  %s156_s16 = int_to_ptr.vmem [resolvable:$true] %s155_s16 }
  0x2a   :  { %v216_v10 = vpack.c.bf16 %v50_v9, %v49_v8  ;;  %v52_v12 = vld [vmem:[#allocation5 + $0x38] sm:$0xff]  ;;  %s278_s17 = scalar_lea.vmem %s156_s16, 128  ;;  %p283_p3 = scmp.lt.s32.totalorder %s156_s16, %s156_s16 }
  0x2b   :  { %211 = vmatpush3.bf16.msra.mxu0 %v210_v5  ;;  %v219_v13 = vpack.c.bf16 %v52_v12, %v51_v11  ;;  %v44_v14 = vld [vmem:[#allocation2] sm:$0xff]  ;;  %p279_p2 = scmp.ne.s32.totalorder %s156_s16, %s278_s17  ;;  %p284_p4 = scmp.lt.s32.totalorder %s278_s17, %s278_s17 }
  0x2c   :  { %212 = vmatprep.subr.bf16.mxu0 %v334_v0  ;;  %v179_v15 = vld [vmem:[%s428_s2] ss:$0 sm:$0xff] }
  0x2d   :  { %p285_p5 = por %p284_p4, %p283_p3 }
  0x2f   :  { %214 = vmatpush3.bf16.msra.mxu0 %v213_v7  ;;  %p286_p6 = pnand %p285_p5, %p279_p2 }
  0x30   :  { %215 = vmatprep.subr.bf16.mxu0 %v334_v0 }
  0x33   :  { %217 = vmatpush3.bf16.msra.mxu0 %v216_v10 }
  0x34   :  { %218 = vmatprep.subr.bf16.mxu0 %v334_v0 }
  0x37   :  { %220 = vmatpush3.bf16.msra.mxu0 %v219_v13 }
  0x3a   :  { %207 = vmatmul.mubr.msk.f32.vlgmr.msra.gmra.mrb[0].mxu0 %vm60_vm1, %v44_v14 }
 0x10d   :  { %v130_v16 = vpop.f32.mrb[0].mxu0 }
 0x10e   :  { %v131_v17 = vadd.f32 %v179_v15, %v130_v16  ;;  %v208_v18 = vpop.f32.mrb[1].mxu0 }
 0x110   :  { %134 = vst [vmem:[#allocation7] sm:$0xff] %v131_v17  ;;  %v135_v19 = vsel %vm60_vm1, %v131_v17, -inf }
 0x111   :  { %136 = vmax.xlane.f32.xlu0 %v135_v19 }
 0x19e   :  { %v137_v20 = vpop.xlane.xlu0 %136 }
 0x19f   :  { %v138_v21 = vsub.f32 %v131_v17, %v137_v20 }
 0x1a1   :  { %v139_v22 = vmul.f32 1.442695, %v138_v21 }
 0x1a3   :  { %230 = vpow2.f32 %v139_v22 }
 0x1ad   :  { %v231_v23 = vpop.eup %230 }
 0x1ae   :  { %v141_v24 = vsel %vm60_vm1, %v231_v23, 0.0 }
 0x1af   :  { %142 = vadd.xlane.f32.xlu0 %v141_v24 }
 0x1b0   :  { %289 = shalt.err (!%p286_p6)
}
 0x1b1   :  { %s290_s19 = scalar_lea.hbm %s429_s3, 128 }
 0x1b2   :  { %p291_p7 = scmp.ne.s32.totalorder %s429_s3, %s290_s19  ;;  %p294_p8 = scmp.lt.u32.totalorder %s290_s19, %s429_s3 }
 0x1b4   :  { %p296_p9 = pnand %p294_p8, %p291_p7 }
 0x1b6   :  { %299 = shalt.err (!%p296_p9)
}
 0x1b7   :  { %158 = dma.vmem_to_hbm [thread:$0]  %s156_s16, 128, %s429_s3, [#allocation4]  }
 0x1b8   :  { %s338_s26 = smov [#allocation8]  }
 0x1b9   :  { %s165_s27 = sshll.u32 %s338_s26, 4  ;;  %s166_s27 = int_to_ptr.vmem [resolvable:$true] %s165_s27 }
 0x1ba   :  { %s300_s28 = scalar_lea.vmem %s166_s27, 128  ;;  %p305_p11 = scmp.lt.s32.totalorder %s166_s27, %s166_s27 }
 0x1bb   :  { %p301_p10 = scmp.ne.s32.totalorder %s166_s27, %s300_s28  ;;  %p306_p12 = scmp.lt.s32.totalorder %s300_s28, %s300_s28 }
 0x1bd   :  { %p307_p13 = por %p306_p12, %p305_p11 }
 0x1bf   :  { %p308_p0 = pnand %p307_p13, %p301_p10 }
 0x23c   :  { %v143_v25 = vpop.xlane.xlu0 %142 }
 0x23d   :  { %232 = vlog2.f32 %v143_v25 }
 0x247   :  { %v233_v26 = vpop.eup %232 }
 0x248   :  { %v145_v27 = vmul.f32 0.6931472, %v233_v26 }
 0x24a   :  { %v146_v28 = vsub.f32 %v138_v21, %v145_v27 }
 0x24c   :  { %v147_v29 = vsel %vm60_vm1, %v146_v28, 0.0 }
 0x24d   :  { %148 = vst [vmem:[#allocation8] sm:$0xff] %v147_v29 }
 0x24e   :  { %311 = shalt.err (!%p308_p0)
}
 0x24f   :  { %s312_s30 = scalar_lea.hbm %s430_s4, 128 }
 0x250   :  { %p313_p1 = scmp.ne.s32.totalorder %s430_s4, %s312_s30  ;;  %p316_p2 = scmp.lt.u32.totalorder %s312_s30, %s430_s4 }
 0x252   :  { %p318_p3 = pnand %p316_p2, %p313_p1 }
 0x254   :  { %321 = shalt.err (!%p318_p3)
}
 0x255   :  { %168 = dma.vmem_to_hbm [thread:$0]  %s166_s27, 128, %s430_s4, [#allocation9]  }
 0x256   :  { %326 = dma.done.wait [#allocation4], 128  }
 0x257   :  { %327 = vsyncadd [#allocation4], 4294967168 }
 0x258   :  { %328 = dma.done.wait [#allocation9], 128  }
 0x259   :  { %329 = vsyncadd [#allocation9], 4294967168 }
 0x25a   :  { %175 = vsyncpa [#allocation3], 1 }
 0x25b   :  { %176 = vsyncpa [#allocation6], 1 }
 0x25c   :  { %177 = vsyncpa [#allocation4], 1 }
 0x25d   :  { %178 = vsyncpa [#allocation9], 1 }

</bundles_post_ra>
